<compile_context>
chip_gen: v7x
topology: tpu7x:2x2x1
jax: 0.10.0
libtpu: 0.0.40
codegen_flags: <defaults>
</compile_context>

<pallas_src>
import jax
import jax.numpy as jnp
from jax.experimental import pallas as pl
from jax.experimental.pallas import tpu as pltpu


_NEG_BIG = -1e30
_DOT_NT = (((1,), (1,)), ((), ()))   # a @ b.T  (contract last dims of both)
_DOT_NN = (((1,), (0,)), ((), ()))   # a @ b


def _round_up(x, m):
    return ((x + m - 1) // m) * m


def _vmem_limit_bytes(tile_n, d, kp, feat_itemsize, use_teacher):
    lane = 128
    dl = _round_up(d, lane)
    b = 2 * tile_n * dl * feat_itemsize        # streamed feature tiles (double-buffered)
    b += 2 * tile_n * lane * 4                 # label tiles (lane-padded)
    b += 2 * kp * dl * 2                       # resident student centroids (bf16)
    if use_teacher:
        b += 2 * kp * dl * 2                   # resident teacher centroids (bf16)
        b += kp * kp * 2                       # teacher softmax table scratch (bf16)
    b += 2 * 8 * lane * 4                      # per-core partial output block
    b += 12 * tile_n * kp * 4                  # elementwise intermediates / spill headroom
    return int(min(max(b, 16 << 20), 64 << 20))


def _make_kernel(*, n, k, kp, tile_n, tiles_per_core, use_teacher, inv_temp,
                 needs_row_mask):
    def kernel(*refs):
        if use_teacher:
            sf_ref, sc_ref, tc_ref, lab_ref, out_ref, acc_ref, tsoft_ref = refs
        else:
            sf_ref, sc_ref, lab_ref, out_ref, acc_ref = refs
            tc_ref = tsoft_ref = None

        c = pl.program_id(0)   # core-parallel axis
        t = pl.program_id(1)   # batch-tile axis (reduction / accumulator axis)

        @pl.when(t == 0)
        def _init():
            acc_ref[0] = 0.0   # loss numerator
            acc_ref[1] = 0.0   # loss denominator
            acc_ref[2] = 0.0   # correct count
            if use_teacher:
                # One-time (per core) teacher Gram softmax table, bf16 MXU operands,
                # f32 softmax math with EXACT division (sum_j tgt_j == 1 identity).
                tc = tc_ref[...]
                g = jax.lax.dot_general(tc, tc, _DOT_NT,
                                        preferred_element_type=jnp.float32)   # (kp, kp)
                g = g * inv_temp
                if kp != k:
                    gcol = jax.lax.broadcasted_iota(jnp.int32, (kp, kp), 1)
                    g = jnp.where(gcol < k, g, _NEG_BIG)
                g_max = jnp.max(g, axis=1, keepdims=True)
                g_exp = jnp.exp(g - g_max)
                g_den = jnp.sum(g_exp, axis=1, keepdims=True)
                tsoft_ref[...] = (g_exp / g_den).astype(jnp.bfloat16)

        # ---- student scores: bf16 MXU operands, f32 accumulation -----------------------
        # logit_scale is already folded into sc_ref (wrapper).
        feats = sf_ref[...].astype(jnp.bfloat16)                              # (tile_n, d)
        s = jax.lax.dot_general(feats, sc_ref[...], _DOT_NT,
                                preferred_element_type=jnp.float32)           # (tile_n, kp)
        if kp != k:
            # Padded-class bias row (tiny, compile-time-constant pattern).
            bias = jnp.where(
                jax.lax.broadcasted_iota(jnp.int32, (1, kp), 1) < k, 0.0, _NEG_BIG)
            s = s + bias

        s_max = jnp.max(s, axis=1, keepdims=True)                             # (tile_n, 1)
        lse = jnp.log(jnp.sum(jnp.exp(s - s_max), axis=1, keepdims=True))
        smax_lse = s_max + lse                                                # logsumexp(s)

        labels = lab_ref[...]                                                 # (tile_n, 1)
        label_t = jnp.where(labels < 0, labels + k, labels)   # torch negative indexing
        col = jax.lax.broadcasted_iota(jnp.int32, (tile_n, kp), 1)
        is_label = col == label_t                                             # (tile_n, kp)
        label_valid = labels >= 0                                             # (tile_n, 1)

        picked_s = jnp.sum(jnp.where(is_label, s, 0.0), axis=1, keepdims=True)

        if needs_row_mask:
            grow = (c * tiles_per_core + t) * tile_n + \
                jax.lax.broadcasted_iota(jnp.int32, (tile_n, 1), 0)
            in_batch = grow < n                                               # (tile_n, 1)

        # ---- loss partial sums ----------------------------------------------------------
        if use_teacher:
            onehot = is_label.astype(jnp.bfloat16)
            tgt = jax.lax.dot_general(onehot, tsoft_ref[...], _DOT_NN,
                                      preferred_element_type=jnp.float32)     # (tile_n, kp)
            # -sum_j tgt_j * log_softmax(s)_j == logsumexp(s) - sum_j tgt_j * s_j
            per_row = smax_lse - jnp.sum(tgt * s, axis=1, keepdims=True)
            if needs_row_mask:
                per_row = jnp.where(in_batch, per_row, 0.0)
                tile_denom = jnp.sum(in_batch.astype(jnp.float32))
            else:
                tile_denom = float(tile_n)
            tile_loss = jnp.sum(per_row)
        else:
            # Hard CE (ignore_index=-1): -log_softmax(s)[label] = logsumexp(s) - s_label
            per_row = jnp.where(label_valid, smax_lse - picked_s, 0.0)
            tile_loss = jnp.sum(per_row)
            tile_denom = jnp.sum(label_valid.astype(jnp.float32))

        # ---- accuracy partial sum (label score == row max <=> label is an argmax) -------
        corr = jnp.logical_and(picked_s == s_max, label_valid)
        tile_correct = jnp.sum(corr.astype(jnp.float32))

        acc_ref[0] = acc_ref[0] + tile_loss
        acc_ref[1] = acc_ref[1] + tile_denom
        acc_ref[2] = acc_ref[2] + tile_correct

        @pl.when(t == tiles_per_core - 1)
        def _finalize():
            lane = jax.lax.broadcasted_iota(jnp.int32, (8, 128), 1)
            vals = jnp.where(lane == 0, acc_ref[0],
                   jnp.where(lane == 1, acc_ref[1],
                   jnp.where(lane == 2, acc_ref[2], 0.0)))
            out_ref[...] = vals

    return kernel


def proto_loss(student_features, student_centroids, teacher_centroids,
               logit_scale_student, teacher_temperature, labels, *,
               tile_n=1024, num_cores=2):
    """Returns (loss, accuracy_percent) matching ProtoLoss.forward."""
    use_teacher = float(teacher_temperature) > 0.0

    n, d = student_features.shape
    k = student_centroids.shape[0]
    kp = _round_up(k, 128)                      # lane-dense class dim

    num_cores = max(1, int(num_cores))
    tile_n = _round_up(max(8, min(int(tile_n), _round_up(n, 8))), 8)
    total_tiles = (n + tile_n - 1) // tile_n
    tpc = (total_tiles + num_cores - 1) // num_cores    # tiles per core
    covered = num_cores * tpc
    np_lab = covered * tile_n
    needs_row_mask = (covered * tile_n) != n

    # Fold logit_scale into the (tiny) student centroid tensor; pad class dim; bf16.
    sc = (student_centroids.astype(jnp.float32) * logit_scale_student).astype(jnp.bfloat16)
    sc = jnp.pad(sc, ((0, kp - k), (0, 0)))
    lab = jnp.pad(labels.astype(jnp.int32), (0, np_lab - n),
                  constant_values=-1).reshape(np_lab, 1)

    if covered == total_tiles:
        feat_idx = lambda ci, ti: (ci * tpc + ti, 0)
    else:
        # Overhang tiles clamp to the last real feature block; their rows are masked
        # out via the (unclamped) global row index inside the kernel.
        feat_idx = lambda ci, ti: (jnp.minimum(ci * tpc + ti, total_tiles - 1), 0)

    in_specs = [
        pl.BlockSpec((tile_n, d), feat_idx),                   # features (native dtype, streamed)
        pl.BlockSpec((kp, d), lambda ci, ti: (0, 0)),          # student centroids (resident)
    ]
    inputs = [student_features, sc]
    scratch = [pltpu.SMEM((3,), jnp.float32)]                  # [loss_sum, denom, correct]
    if use_teacher:
        tc = jnp.pad(teacher_centroids.astype(jnp.bfloat16), ((0, kp - k), (0, 0)))
        in_specs.append(pl.BlockSpec((kp, d), lambda ci, ti: (0, 0)))   # teacher centroids
        inputs.append(tc)
        scratch.append(pltpu.VMEM((kp, kp), jnp.bfloat16))              # teacher softmax table
    in_specs.append(pl.BlockSpec((tile_n, 1), lambda ci, ti: (ci * tpc + ti, 0)))  # labels
    inputs.append(lab)

    kernel = _make_kernel(
        n=n, k=k, kp=kp, tile_n=tile_n, tiles_per_core=tpc,
        use_teacher=use_teacher,
        inv_temp=(1.0 / float(teacher_temperature)) if use_teacher else 1.0,
        needs_row_mask=needs_row_mask)

    parts = pl.pallas_call(
        kernel,
        out_shape=jax.ShapeDtypeStruct((num_cores * 8, 128), jnp.float32),
        grid_spec=pltpu.PrefetchScalarGridSpec(
            num_scalar_prefetch=0,
            grid=(num_cores, tpc),
            in_specs=in_specs,
            out_specs=pl.BlockSpec((8, 128), lambda ci, ti: (ci, 0)),
            scratch_shapes=scratch),
        compiler_params=pltpu.CompilerParams(
            dimension_semantics=("parallel", "arbitrary"),
            vmem_limit_bytes=_vmem_limit_bytes(
                tile_n, d, kp, student_features.dtype.itemsize, use_teacher)),
    )(*inputs)

    parts = parts.reshape(num_cores, 8, 128)
    loss_sum = jnp.sum(parts[:, 0, 0])
    denom = jnp.sum(parts[:, 0, 1])
    correct = jnp.sum(parts[:, 0, 2])
    loss = loss_sum / jnp.maximum(denom, 1.0)
    accuracy = correct / n * 100.0
    return loss, accuracy


if __name__ == "__main__":
    key = jax.random.PRNGKey(0)
    k1, k2, k3, k4, k5, k6, k7, k8 = jax.random.split(key, 8)

    # Small case consistent with the module: batch=8, hidden=32, prototypes=16.
    N, D, K = 8, 32, 16
    student_features = jax.random.normal(k1, (N, D), jnp.float32)
    student_centroids = jax.random.normal(k2, (K, D), jnp.float32)
    teacher_centroids = jax.random.normal(k3, (K, D), jnp.float32)
    labels = jax.random.randint(k4, (N,), 0, K, jnp.int32)
    logit_scale_student = 10.0

    # Teacher-distillation branch (teacher_temperature > 0).
    loss_t, acc_t = proto_loss(student_features, student_centroids, teacher_centroids,
                               logit_scale_student, 0.07, labels)
    # Hard-label branch (teacher_temperature == 0).
    loss_h, acc_h = proto_loss(student_features, student_centroids, teacher_centroids,
                               logit_scale_student, 0.0, labels)
    jax.block_until_ready((loss_t, acc_t, loss_h, acc_h))

    # Larger odd-shaped case: multi-tile grid split over the 2-core axis, K padding,
    # partial/overhang tiles, ignore_index=-1 rows, non-128 hidden dim.
    N2, D2, K2 = 600, 48, 20
    sf2 = jax.random.normal(k5, (N2, D2), jnp.float32)
    sc2 = jax.random.normal(k6, (K2, D2), jnp.float32)
    tc2 = jax.random.normal(k7, (K2, D2), jnp.float32)
    lab2 = jax.random.randint(k8, (N2,), 0, K2, jnp.int32)
    lab2 = lab2.at[:7].set(-1)

    loss2_t, acc2_t = proto_loss(sf2, sc2, tc2, logit_scale_student, 0.07, lab2, tile_n=256)
    loss2_h, acc2_h = proto_loss(sf2, sc2, tc2, logit_scale_student, 0.0, lab2)
    jax.block_until_ready((loss2_t, acc2_t, loss2_h, acc2_h))

    print("KERNEL_OK")
</pallas_src>

<mosaic_0001>
module attributes {stable_mosaic.version = 11 : i64} {
  func.func @kernel(%arg0: i32, %arg1: i32, %arg2: memref<8x32xf32, #tpu.memory_space<vmem>>, %arg3: memref<128x32xbf16, #tpu.memory_space<vmem>>, %arg4: memref<128x32xbf16, #tpu.memory_space<vmem>>, %arg5: memref<8x1xi32, #tpu.memory_space<vmem>>, %arg6: memref<8x128xf32, #tpu.memory_space<vmem>>, %arg7: memref<3xf32, #tpu.memory_space<smem>>, %arg8: memref<128x128xbf16, #tpu.memory_space<vmem>>) attributes {dimension_semantics = [#tpu.dimension_semantics<parallel>, #tpu.dimension_semantics<arbitrary>], iteration_bounds = array<i64: 2, 1>, scalar_prefetch = 0 : i64, scratch_operands = 2 : i64, tpu.core_type = #tpu.core_type<tc>, window_params = [{transform_indices = @transform_0, window_bounds = array<i64: 8, 32>}, {pipeline_mode = #tpu.pipeline_mode<synchronous>, transform_indices = @transform_1, window_bounds = array<i64: 128, 32>}, {pipeline_mode = #tpu.pipeline_mode<synchronous>, transform_indices = @transform_2, window_bounds = array<i64: 128, 32>}, {transform_indices = @transform_3, window_bounds = array<i64: 8, 1>}, {transform_indices = @transform_4, window_bounds = array<i64: 8, 128>}]} {
    %c0_i32 = arith.constant 0 : i32
    %0 = arith.cmpi eq, %arg1, %c0_i32 : i32
    %1 = arith.extui %0 : i1 to i32
    %c0_i32_0 = arith.constant 0 : i32
    %2 = arith.cmpi ne, %1, %c0_i32_0 : i32
    scf.if %2 {
      %cst_30 = arith.constant 0.000000e+00 : f32
      %c0_31 = arith.constant 0 : index
      %88 = memref.load %arg7[%c0_31] : memref<3xf32, #tpu.memory_space<smem>>
      memref.store %cst_30, %arg7[%c0_31] : memref<3xf32, #tpu.memory_space<smem>>
      %cst_32 = arith.constant 0.000000e+00 : f32
      %c1_33 = arith.constant 1 : index
      %89 = memref.load %arg7[%c1_33] : memref<3xf32, #tpu.memory_space<smem>>
      memref.store %cst_32, %arg7[%c1_33] : memref<3xf32, #tpu.memory_space<smem>>
      %cst_34 = arith.constant 0.000000e+00 : f32
      %c2_35 = arith.constant 2 : index
      %90 = memref.load %arg7[%c2_35] : memref<3xf32, #tpu.memory_space<smem>>
      memref.store %cst_34, %arg7[%c2_35] : memref<3xf32, #tpu.memory_space<smem>>
      %c0_36 = arith.constant 0 : index
      %c0_37 = arith.constant 0 : index
      %91 = vector.load %arg4[%c0_36, %c0_37] : memref<128x32xbf16, #tpu.memory_space<vmem>>, vector<128x32xbf16>
      %cst_38 = arith.constant dense<0.000000e+00> : vector<128x128xf32>
      %92 = tpu.matmul %91, %91, %cst_38 {dimension_numbers = #tpu.dot_dimension_numbers<[1], [1], [0], [0], [0, 0, 1, 0], [], []>} : vector<128x32xbf16>, vector<128x32xbf16>, vector<128x128xf32> -> vector<128x128xf32>
      %cst_39 = arith.constant 14.2857141 : f32
      %93 = vector.broadcast %cst_39 : f32 to vector<128x128xf32>
      %94 = arith.mulf %92, %93 : vector<128x128xf32>
      %95 = tpu.iota {dimensions = array<i32: 1>} : vector<128x128xi32>
      %c16_i32_40 = arith.constant 16 : i32
      %96 = vector.broadcast %c16_i32_40 : i32 to vector<128x128xi32>
      %97 = arith.cmpi slt, %95, %96 : vector<128x128xi32>
      %cst_41 = arith.constant -1.000000e+30 : f32
      %98 = vector.broadcast %cst_41 : f32 to vector<128x128xf32>
      %99 = arith.select %97, %94, %98 : vector<128x128xi1>, vector<128x128xf32>
      %cst_42 = arith.constant dense<0xFF800000> : vector<128xf32>
      %100 = vector.multi_reduction <maximumf>, %99, %cst_42 [1] : vector<128x128xf32> to vector<128xf32>
      %101 = vector.shape_cast %100 : vector<128xf32> to vector<128x1xf32>
      %102 = vector.broadcast %101 : vector<128x1xf32> to vector<128x128xf32>
      %103 = arith.subf %99, %102 : vector<128x128xf32>
      %104 = math.exp %103 : vector<128x128xf32>
      %cst_43 = arith.constant dense<0.000000e+00> : vector<128xf32>
      %105 = vector.multi_reduction <add>, %104, %cst_43 [1] : vector<128x128xf32> to vector<128xf32>
      %106 = vector.shape_cast %105 : vector<128xf32> to vector<128x1xf32>
      %107 = vector.broadcast %106 : vector<128x1xf32> to vector<128x128xf32>
      %108 = arith.divf %104, %107 : vector<128x128xf32>
      %109 = arith.truncf %108 : vector<128x128xf32> to vector<128x128xbf16>
      %c0_44 = arith.constant 0 : index
      %c0_45 = arith.constant 0 : index
      %110 = vector.load %arg8[%c0_44, %c0_45] : memref<128x128xbf16, #tpu.memory_space<vmem>>, vector<128x128xbf16>
      tpu.vector_store %arg8[%c0_44, %c0_45], %109 {strides = array<i32>} : memref<128x128xbf16, #tpu.memory_space<vmem>>, vector<128x128xbf16>,
    } else {
    }
    %c0 = arith.constant 0 : index
    %c0_1 = arith.constant 0 : index
    %3 = vector.load %arg2[%c0, %c0_1] : memref<8x32xf32, #tpu.memory_space<vmem>>, vector<8x32xf32>
    %4 = arith.truncf %3 : vector<8x32xf32> to vector<8x32xbf16>
    %c0_2 = arith.constant 0 : index
    %c0_3 = arith.constant 0 : index
    %5 = vector.load %arg3[%c0_2, %c0_3] : memref<128x32xbf16, #tpu.memory_space<vmem>>, vector<128x32xbf16>
    %cst = arith.constant dense<0.000000e+00> : vector<8x128xf32>
    %6 = tpu.matmul %4, %5, %cst {dimension_numbers = #tpu.dot_dimension_numbers<[1], [1], [0], [0], [0, 0, 1, 0], [], []>} : vector<8x32xbf16>, vector<128x32xbf16>, vector<8x128xf32> -> vector<8x128xf32>
    %7 = tpu.iota {dimensions = array<i32: 1>} : vector<1x128xi32>
    %c16_i32 = arith.constant 16 : i32
    %8 = vector.broadcast %c16_i32 : i32 to vector<1x128xi32>
    %9 = arith.cmpi slt, %7, %8 : vector<1x128xi32>
    %cst_4 = arith.constant 0.000000e+00 : f32
    %cst_5 = arith.constant -1.000000e+30 : f32
    %10 = vector.broadcast %cst_4 : f32 to vector<1x128xf32>
    %11 = vector.broadcast %cst_5 : f32 to vector<1x128xf32>
    %12 = arith.select %9, %10, %11 : vector<1x128xi1>, vector<1x128xf32>
    %13 = vector.broadcast %12 : vector<1x128xf32> to vector<8x128xf32>
    %14 = arith.addf %6, %13 : vector<8x128xf32>
    %cst_6 = arith.constant dense<0xFF800000> : vector<8xf32>
    %15 = vector.multi_reduction <maximumf>, %14, %cst_6 [1] : vector<8x128xf32> to vector<8xf32>
    %16 = vector.shape_cast %15 : vector<8xf32> to vector<8x1xf32>
    %17 = vector.broadcast %16 : vector<8x1xf32> to vector<8x128xf32>
    %18 = arith.subf %14, %17 : vector<8x128xf32>
    %19 = math.exp %18 : vector<8x128xf32>
    %cst_7 = arith.constant dense<0.000000e+00> : vector<8xf32>
    %20 = vector.multi_reduction <add>, %19, %cst_7 [1] : vector<8x128xf32> to vector<8xf32>
    %21 = vector.shape_cast %20 : vector<8xf32> to vector<8x1xf32>
    %22 = math.log %21 : vector<8x1xf32>
    %23 = arith.addf %16, %22 : vector<8x1xf32>
    %c0_8 = arith.constant 0 : index
    %c0_9 = arith.constant 0 : index
    %24 = vector.load %arg5[%c0_8, %c0_9] : memref<8x1xi32, #tpu.memory_space<vmem>>, vector<8x1xi32>
    %c0_i32_10 = arith.constant 0 : i32
    %25 = vector.broadcast %c0_i32_10 : i32 to vector<8x1xi32>
    %26 = arith.cmpi slt, %24, %25 : vector<8x1xi32>
    %c16_i32_11 = arith.constant 16 : i32
    %27 = vector.broadcast %c16_i32_11 : i32 to vector<8x1xi32>
    %28 = arith.addi %24, %27 : vector<8x1xi32>
    %29 = arith.select %26, %28, %24 : vector<8x1xi1>, vector<8x1xi32>
    %30 = tpu.iota {dimensions = array<i32: 1>} : vector<8x128xi32>
    %31 = vector.broadcast %29 : vector<8x1xi32> to vector<8x128xi32>
    %32 = arith.cmpi eq, %30, %31 : vector<8x128xi32>
    %c0_i32_12 = arith.constant 0 : i32
    %33 = vector.broadcast %c0_i32_12 : i32 to vector<8x1xi32>
    %34 = arith.cmpi sge, %24, %33 : vector<8x1xi32>
    %cst_13 = arith.constant 0.000000e+00 : f32
    %35 = vector.broadcast %cst_13 : f32 to vector<8x128xf32>
    %36 = arith.select %32, %14, %35 : vector<8x128xi1>, vector<8x128xf32>
    %cst_14 = arith.constant dense<0.000000e+00> : vector<8xf32>
    %37 = vector.multi_reduction <add>, %36, %cst_14 [1] : vector<8x128xf32> to vector<8xf32>
    %38 = vector.shape_cast %37 : vector<8xf32> to vector<8x1xf32>
    %c1_i32 = arith.constant 1 : i32
    %39 = arith.muli %arg0, %c1_i32 : i32
    %40 = arith.addi %39, %arg1 : i32
    %c8_i32 = arith.constant 8 : i32
    %41 = arith.muli %40, %c8_i32 : i32
    %42 = tpu.iota {dimensions = array<i32: 0>} : vector<8x1xi32>
    %43 = vector.broadcast %41 : i32 to vector<8x1xi32>
    %44 = arith.addi %43, %42 : vector<8x1xi32>
    %c8_i32_15 = arith.constant 8 : i32
    %45 = vector.broadcast %c8_i32_15 : i32 to vector<8x1xi32>
    %46 = arith.cmpi slt, %44, %45 : vector<8x1xi32>
    %47 = arith.extui %32 : vector<8x128xi1> to vector<8x128xi32>
    %48 = arith.sitofp %47 : vector<8x128xi32> to vector<8x128xf32>
    %49 = arith.truncf %48 : vector<8x128xf32> to vector<8x128xbf16>
    %c0_16 = arith.constant 0 : index
    %c0_17 = arith.constant 0 : index
    %50 = vector.load %arg8[%c0_16, %c0_17] : memref<128x128xbf16, #tpu.memory_space<vmem>>, vector<128x128xbf16>
    %cst_18 = arith.constant dense<0.000000e+00> : vector<8x128xf32>
    %51 = tpu.matmul %49, %50, %cst_18 {dimension_numbers = #tpu.dot_dimension_numbers<[1], [0], [0], [1], [0, 0, 1, 1], [], []>} : vector<8x128xbf16>, vector<128x128xbf16>, vector<8x128xf32> -> vector<8x128xf32>
    %52 = arith.mulf %51, %14 : vector<8x128xf32>
    %cst_19 = arith.constant dense<0.000000e+00> : vector<8xf32>
    %53 = vector.multi_reduction <add>, %52, %cst_19 [1] : vector<8x128xf32> to vector<8xf32>
    %54 = vector.shape_cast %53 : vector<8xf32> to vector<8x1xf32>
    %55 = arith.subf %23, %54 : vector<8x1xf32>
    %cst_20 = arith.constant 0.000000e+00 : f32
    %56 = vector.broadcast %cst_20 : f32 to vector<8x1xf32>
    %57 = arith.select %46, %55, %56 : vector<8x1xi1>, vector<8x1xf32>
    %58 = arith.extui %46 : vector<8x1xi1> to vector<8x1xi32>
    %59 = arith.sitofp %58 : vector<8x1xi32> to vector<8x1xf32>
    %60 = vector.shape_cast %59 : vector<8x1xf32> to vector<1x8x1xf32>
    %cst_21 = arith.constant dense<0.000000e+00> : vector<1xf32>
    %61 = vector.multi_reduction <add>, %60, %cst_21 [1, 2] : vector<1x8x1xf32> to vector<1xf32>
    %62 = vector.shape_cast %61 : vector<1xf32> to vector<1x1x1xf32>
    %63 = vector.extract %62[0, 0, 0] : f32 from vector<1x1x1xf32>
    %64 = vector.shape_cast %57 : vector<8x1xf32> to vector<1x8x1xf32>
    %cst_22 = arith.constant dense<0.000000e+00> : vector<1xf32>
    %65 = vector.multi_reduction <add>, %64, %cst_22 [1, 2] : vector<1x8x1xf32> to vector<1xf32>
    %66 = vector.shape_cast %65 : vector<1xf32> to vector<1x1x1xf32>
    %67 = vector.extract %66[0, 0, 0] : f32 from vector<1x1x1xf32>
    %68 = arith.cmpf oeq, %38, %16 : vector<8x1xf32>
    %69 = arith.andi %68, %34 : vector<8x1xi1>
    %70 = arith.extui %69 : vector<8x1xi1> to vector<8x1xi32>
    %71 = arith.sitofp %70 : vector<8x1xi32> to vector<8x1xf32>
    %72 = vector.shape_cast %71 : vector<8x1xf32> to vector<1x8x1xf32>
    %cst_23 = arith.constant dense<0.000000e+00> : vector<1xf32>
    %73 = vector.multi_reduction <add>, %72, %cst_23 [1, 2] : vector<1x8x1xf32> to vector<1xf32>
    %74 = vector.shape_cast %73 : vector<1xf32> to vector<1x1x1xf32>
    %75 = vector.extract %74[0, 0, 0] : f32 from vector<1x1x1xf32>
    %c0_24 = arith.constant 0 : index
    %76 = memref.load %arg7[%c0_24] : memref<3xf32, #tpu.memory_space<smem>>
    %77 = arith.addf %76, %67 : f32
    %c0_25 = arith.constant 0 : index
    %78 = memref.load %arg7[%c0_25] : memref<3xf32, #tpu.memory_space<smem>>
    memref.store %77, %arg7[%c0_25] : memref<3xf32, #tpu.memory_space<smem>>
    %c1 = arith.constant 1 : index
    %79 = memref.load %arg7[%c1] : memref<3xf32, #tpu.memory_space<smem>>
    %80 = arith.addf %79, %63 : f32
    %c1_26 = arith.constant 1 : index
    %81 = memref.load %arg7[%c1_26] : memref<3xf32, #tpu.memory_space<smem>>
    memref.store %80, %arg7[%c1_26] : memref<3xf32, #tpu.memory_space<smem>>
    %c2 = arith.constant 2 : index
    %82 = memref.load %arg7[%c2] : memref<3xf32, #tpu.memory_space<smem>>
    %83 = arith.addf %82, %75 : f32
    %c2_27 = arith.constant 2 : index
    %84 = memref.load %arg7[%c2_27] : memref<3xf32, #tpu.memory_space<smem>>
    memref.store %83, %arg7[%c2_27] : memref<3xf32, #tpu.memory_space<smem>>
    %c0_i32_28 = arith.constant 0 : i32
    %85 = arith.cmpi eq, %arg1, %c0_i32_28 : i32
    %86 = arith.extui %85 : i1 to i32
    %c0_i32_29 = arith.constant 0 : i32
    %87 = arith.cmpi ne, %86, %c0_i32_29 : i32
    scf.if %87 {
      %88 = tpu.iota {dimensions = array<i32: 1>} : vector<8x128xi32>
      %c0_i32_30 = arith.constant 0 : i32
      %89 = vector.broadcast %c0_i32_30 : i32 to vector<8x128xi32>
      %90 = arith.cmpi eq, %88, %89 : vector<8x128xi32>
      %c0_31 = arith.constant 0 : index
      %91 = memref.load %arg7[%c0_31] : memref<3xf32, #tpu.memory_space<smem>>
      %c1_i32_32 = arith.constant 1 : i32
      %92 = vector.broadcast %c1_i32_32 : i32 to vector<8x128xi32>
      %93 = arith.cmpi eq, %88, %92 : vector<8x128xi32>
      %c1_33 = arith.constant 1 : index
      %94 = memref.load %arg7[%c1_33] : memref<3xf32, #tpu.memory_space<smem>>
      %c2_i32 = arith.constant 2 : i32
      %95 = vector.broadcast %c2_i32 : i32 to vector<8x128xi32>
      %96 = arith.cmpi eq, %88, %95 : vector<8x128xi32>
      %c2_34 = arith.constant 2 : index
      %97 = memref.load %arg7[%c2_34] : memref<3xf32, #tpu.memory_space<smem>>
      %cst_35 = arith.constant 0.000000e+00 : f32
      %98 = vector.broadcast %97 : f32 to vector<8x128xf32>
      %99 = vector.broadcast %cst_35 : f32 to vector<8x128xf32>
      %100 = arith.select %96, %98, %99 : vector<8x128xi1>, vector<8x128xf32>
      %101 = vector.broadcast %94 : f32 to vector<8x128xf32>
      %102 = arith.select %93, %101, %100 : vector<8x128xi1>, vector<8x128xf32>
      %103 = vector.broadcast %91 : f32 to vector<8x128xf32>
      %104 = arith.select %90, %103, %102 : vector<8x128xi1>, vector<8x128xf32>
      %c0_36 = arith.constant 0 : index
      %c0_37 = arith.constant 0 : index
      %105 = vector.load %arg6[%c0_36, %c0_37] : memref<8x128xf32, #tpu.memory_space<vmem>>, vector<8x128xf32>
      tpu.vector_store %arg6[%c0_36, %c0_37], %104 {strides = array<i32>} : memref<8x128xf32, #tpu.memory_space<vmem>>, vector<8x128xf32>,
    } else {
    }
    return
  }
  func.func @transform_0(%arg0: i32, %arg1: i32) -> (i32, i32) {
    %c1_i32 = arith.constant 1 : i32
    %0 = arith.muli %arg0, %c1_i32 : i32
    %1 = arith.addi %0, %arg1 : i32
    %c0_i32 = arith.constant 0 : i32
    %2 = arith.minsi %1, %c0_i32 : i32
    %c0_i32_0 = arith.constant 0 : i32
    %c0_i32_1 = arith.constant 0 : i32
    return %2, %c0_i32_0 : i32, i32
  }
  func.func @transform_1(%arg0: i32, %arg1: i32) -> (i32, i32) {
    %c0_i32 = arith.constant 0 : i32
    %c0_i32_0 = arith.constant 0 : i32
    %c0_i32_1 = arith.constant 0 : i32
    return %c0_i32, %c0_i32_0 : i32, i32
  }
  func.func @transform_2(%arg0: i32, %arg1: i32) -> (i32, i32) {
    %c0_i32 = arith.constant 0 : i32
    %c0_i32_0 = arith.constant 0 : i32
    %c0_i32_1 = arith.constant 0 : i32
    return %c0_i32, %c0_i32_0 : i32, i32
  }
  func.func @transform_3(%arg0: i32, %arg1: i32) -> (i32, i32) {
    %c1_i32 = arith.constant 1 : i32
    %0 = arith.muli %arg0, %c1_i32 : i32
    %1 = arith.addi %0, %arg1 : i32
    %c0_i32 = arith.constant 0 : i32
    %c0_i32_0 = arith.constant 0 : i32
    return %1, %c0_i32 : i32, i32
  }
  func.func @transform_4(%arg0: i32, %arg1: i32) -> (i32, i32) {
    %c0_i32 = arith.constant 0 : i32
    %c0_i32_0 = arith.constant 0 : i32
    return %arg0, %c0_i32 : i32, i32
  }
}

</mosaic_0001>

<bundles_post_ra>
// kernel: tpu_custom_call.1
= control target key start
LH: loop header
LB: loop body
LE: loop exit
PB: predicated region body
PF: predicated region fallthrough
CT: control target
= control target key end

     0   :  { %9 = vsyncpa [#allocation5], 0  ;;  %s1857_s0 = inlined_call_operand.vmem [shape: f32[8,32], index: 0, kind: input, shape index: {}]   ;;  %s1858_s1 = inlined_call_operand.vmem [shape: bf16[128,32], index: 1, kind: input, shape index: {}]   ;;  %s1859_s2 = inlined_call_operand.vmem [shape: bf16[128,32], index: 2, kind: input, shape index: {}]   ;;  %s1860_s3 = inlined_call_operand.vmem [shape: s32[16,1], index: 3, kind: input, shape index: {}]   ;;  %s1861_s4 = inlined_call_operand.hbm [shape: f32[16,128], index: 4, kind: output, shape index: {}]  }
   0x1   :  { %11 = vsyncpa [#allocation5 + $0x1], 0  ;;  %s1433_s15 = smov 0   ;;  %s1435_s16 = smov 0  }
   0x2   :  { %s1437_s17 = smov 0   ;;  %s1439_s18 = smov 0  }
   0x3   :  { %s1441_s19 = smov 0   ;;  %s1443_s20 = smov 0  }
   0x4 LB: > { %s1007_s21 = sadd.s32 4294967295, %s1400_s20   ;;  %s1008_s22 = sadd.s32 4294967294, %s1400_s20   ;;  %s1400_s20 = sphi %s1443_s20, %s17_s20   ;;  %s1396_s19 = sphi %s1441_s19, %s1868_s19   ;;  %s1392_s18 = sphi %s1439_s18, %s1867_s18   ;;  %s1388_s17 = sphi %s1437_s17, %s1866_s17   ;;  %s1384_s16 = sphi %s1435_s16, %s1865_s16   ;;  %s1380_s15 = sphi %s1433_s15, %s1864_s15  }
   0x5   : > { %s29_s23 = sadd.s32 1, %s1396_s19  ;;  %s138_s24 = sadd.s32 1, %s1388_s17 }
   0x6   : > { %p31_p0 = scmp.ge.s32.totalorder %s29_s23, 2  ;;  %p148_p1 = scmp.ne.s32.totalorder %s1388_s17, %s1384_s16 }
   0x7   : > { %p149_p2 = scmp.eq.s32.totalorder %s1007_s21, 1  ;;  %p154_p3 = scmp.ne.s32.totalorder %s1384_s16, %s1380_s15 }
   0x8   : > { %s1870_s23 = smov (%p31_p0, %s29_s23), 0  ;;  %p155_p5 = scmp.eq.s32.totalorder %s1008_s22, 1 }
   0x9   : > { %p1473_p4 = por %p149_p2, %p148_p1  ;;  %s135_s26 = ssub.s32 %s1396_s19, %s1870_s23 }
   0xa   : > { %p1011_p6 = scmp.ge.s32.totalorder %s1400_s20, 1  ;;  %p136_p7 = scmp.eq.s32.totalorder %s135_s26, 0 }
   0xb   : > { %p1480_p8 = por %p155_p5, %p154_p3  ;;  %p201_p9 = scmp.lt.s32.totalorder %s1400_s20, 3 }
   0xc   : > { %s1486_s28 = scalar_select %p136_p7, %s1388_s17, %s138_s24  }
   0xd   : > { %p202_p10 = pnand %p1011_p6, %p201_p9 }
   0xe   : > { %v1238_v0 = vld [vmem:[%s1859_s2] sm:$0xff] (!%p202_p10)   ;;  %vm317_vm0 = vcmask (!%p202_p10), 261120   ;;  %v1494_v1 = vld [vmem:[%s1859_s2 + $0x8] sm:$0xff] (!%p202_p10)   ;;  %v1402_v3 = vmov (!%p202_p10), 0.0   ;;  %v1505_v4 = vld [vmem:[%s1859_s2 + $0x10] sm:$0xff] (!%p202_p10)   ;;  %vm1403_vm1 = vmmov (!%p202_p10), 0   ;;  %v455_v35 = vlaneseq (!%p202_p10) }
   0xf   : > { %205 = sbr.rel (%p202_p10) target bundleno = 1234 (0x4d2), region = 36  ;;  %1163 = vmatprep.subr.msk.bf16.mxu0 (!%p202_p10), %vm317_vm0, %v1238_v0  ;;  %v319_v2 = vsel (!%p202_p10), %vm317_vm0, %v1238_v0, 0  ;;  %1107 = vmatprep.mubr.msk.bf16.mxu0 (!%p202_p10), %vm317_vm0, %v1238_v0  ;;  %v322_v5 = vsel (!%p202_p10), %vm317_vm0, %v1494_v1, 0  ;;  %v1246_v6 = vld [vmem:[%s1858_s1] sm:$0xff] (!%p202_p10)   ;;  %v1247_v8 = vld [vmem:[%s1858_s1 + $0x8] sm:$0xff] (!%p202_p10)   ;;  %v325_v9 = vsel (!%p202_p10), %vm317_vm0, %v1505_v4, 0 }
  0x10   : > { %1092 = vmatpush3.bf16.xpose.msra.mxu0 (!%p202_p10), %v319_v2  ;;  %1123 = vmatprep.subr.bf16.mxu1 (!%p202_p10), %v1402_v3  ;;  %v701_v7 = vsel (!%p202_p10), %vm317_vm0, %v1246_v6, 0  ;;  %v1241_v10 = vld [vmem:[%s1859_s2 + $0x18] sm:$0xff] (!%p202_p10)   ;;  %v704_v11 = vsel (!%p202_p10), %vm317_vm0, %v1247_v8, 0  ;;  %v1248_v12 = vld [vmem:[%s1858_s1 + $0x10] sm:$0xff] (!%p202_p10)   ;;  %v1242_v14 = vld [vmem:[%s1859_s2 + $0x20] sm:$0xff] (!%p202_p10)   ;;  %p235_p11 = scmp.lt.s32.totalorder (!%p202_p10), %s1392_s18, 0 }
  0x11   : > { %1164 = vmatprep.subr.msk.bf16.mxu0 (!%p202_p10), %vm317_vm0, %v1494_v1  ;;  %1124 = vmatpush3.bf16.xpose.msra.mxu1 (!%p202_p10), %v701_v7  ;;  %v328_v13 = vsel (!%p202_p10), %vm317_vm0, %v1241_v10, 0  ;;  %v707_v15 = vsel (!%p202_p10), %vm317_vm0, %v1248_v12, 0  ;;  %v1249_v16 = vld [vmem:[%s1858_s1 + $0x18] sm:$0xff] (!%p202_p10)   ;;  %v331_v17 = vsel (!%p202_p10), %vm317_vm0, %v1242_v14, 0  ;;  %v1243_v18 = vld [vmem:[%s1859_s2 + $0x28] sm:$0xff] (!%p202_p10)   ;;  %v1250_v20 = vld [vmem:[%s1858_s1 + $0x20] sm:$0xff] (!%p202_p10)  }
  0x12   : > { %1125 = vmatprep.subr.bf16.mxu1 (!%p202_p10), %v1402_v3  ;;  %1139 = vmatprep.mubr.msk.bf16.mxu1 (!%p202_p10), %vm1403_vm1, %v1402_v3  ;;  %v710_v19 = vsel (!%p202_p10), %vm317_vm0, %v1249_v16, 0  ;;  %v334_v21 = vsel (!%p202_p10), %vm317_vm0, %v1243_v18, 0  ;;  %v1244_v22 = vld [vmem:[%s1859_s2 + $0x30] sm:$0xff] (!%p202_p10)   ;;  %v713_v23 = vsel (!%p202_p10), %vm317_vm0, %v1250_v20, 0  ;;  %v1251_v24 = vld [vmem:[%s1858_s1 + $0x28] sm:$0xff] (!%p202_p10)   ;;  %v1245_v26 = vld [vmem:[%s1859_s2 + $0x38] sm:$0xff] (!%p202_p10)  }
  0x13   : > { %v337_v25 = vsel (!%p202_p10), %vm317_vm0, %v1244_v22, 0  ;;  %v716_v27 = vsel (!%p202_p10), %vm317_vm0, %v1251_v24, 0  ;;  %v1252_v28 = vld [vmem:[%s1858_s1 + $0x30] sm:$0xff] (!%p202_p10)   ;;  %v340_v29 = vsel (!%p202_p10), %vm317_vm0, %v1245_v26, 0  ;;  %v1253_v31 = vld [vmem:[%s1858_s1 + $0x38] sm:$0xff] (!%p202_p10)   ;;  %v1598_v36 = vand.u32 (!%p202_p10), 127, %v455_v35 }
  0x14   : > { %v719_v30 = vsel (!%p202_p10), %vm317_vm0, %v1252_v28, 0  ;;  %v722_v32 = vsel (!%p202_p10), %vm317_vm0, %v1253_v31, 0  ;;  %p245_p12 = scmp.lt.s32.totalorder (!%p202_p10), %s1392_s18, 1  ;;  %s1043_s13 = sshll.u32 (!%p202_p10), %s1392_s18, 3  ;;  %vm851_vm7 = vcmask (!%p202_p10), 7168  }
  0x15   : > { %vm457_vm2 = vcmp.lt.s32.totalorder (!%p202_p10), %v1598_v36, 16  ;;  %s231_s14 = sand.u32 (!%p202_p10), 1, %s1384_s16   ;;  %vm905_vm11 = vcmp.eq.s32.totalorder (!%p202_p10), %v1598_v36, 2  ;;  %s1054_s26 = sshll.u32 (!%p202_p10), %s1392_s18, 7  ;;  %vm903_vm12 = vcmp.eq.s32.totalorder (!%p202_p10), %v1598_v36, 1  ;;  %vm901_vm13 = vcmp.eq.s32.totalorder (!%p202_p10), %v1598_v36, 0 }
  0x16   : > { %s236_s24 = scalar_select %p235_p11, %s1392_s18, 0 }
  0x17   : > { %s246_s8 = scalar_select %p245_p12, %s1392_s18, 1 }
  0x18   : > { %1094 = vmatpush3.bf16.xpose.msra.mxu0 %v322_v5  ;;  %s1872_s24 = smov (!%p235_p11, %s236_s24), 0  ;;  %s1012_s21 = sshll.u32 %s231_s14, 3 }
  0x19   : > { %1165 = vmatprep.subr.msk.bf16.mxu0 %vm317_vm0, %v1505_v4  ;;  %1126 = vmatpush3.bf16.xpose.msra.mxu1 %v704_v11  ;;  %s1016_s30 = sshll.u32 %s1872_s24, 3  ;;  %s1017_s9 = sshll.u32 %s246_s8, 3 }
  0x1a   : > { %1127 = vmatprep.subr.bf16.mxu1 %v1402_v3  ;;  %s240_s7 = scalar_lea.vmem %s1857_s0, %s1016_s30  ;;  %s248_s12 = scalar_lea.vmem %s1860_s3, %s1017_s9 }
  0x1b   : > { %v634_v33 = vld [vmem:[%s240_s7] sm:$0xff]  ;;  %s233_s30 = scalar_lea.vmem [#allocation4], %s1012_s21  ;;  %s1810_s8 = scalar_lea.hbm %s1861_s4, %s1054_s26 }
  0x1c   : > { %v635_v34 = vpack.c.bf16 %v634_v33, %v634_v33  ;;  %s928_s5 = sshll.u32 %s233_s30, 4  ;;  %s915_s18 = scalar_lea.sflag [#allocation5], %s231_s14  ;;  %s1812_s5 = int_to_ptr.vmem [resolvable:$true] %s928_s5 }
  0x1d   : > { %s1322_s9 = scalar_lea.vmem %s1812_s5, 128  ;;  %s1407_s10 = smov [#allocation4]  }
  0x1e   : > { %p1323_p13 = scmp.ne.s32.totalorder %s1812_s5, %s1322_s9  ;;  %s1326_s11 = sshll.u32 %s1407_s10, 4  ;;  %s1327_s11 = int_to_ptr.vmem [resolvable:$false] %s1326_s11 }
  0x1f   : > { %p1329_p2 = scmp.lt.s32.totalorder %s1812_s5, %s1327_s11 }
  0x20   : > { %1096 = vmatpush3.bf16.xpose.msra.mxu0 %v325_v9  ;;  %p1324_p0 = pnand %p1323_p13, %p1473_p4 }
  0x21   : > { %1166 = vmatprep.subr.msk.bf16.mxu0 %vm317_vm0, %v1241_v10  ;;  %1128 = vmatpush3.bf16.xpose.msra.mxu1 %v707_v15 }
  0x22   : > { %1129 = vmatprep.subr.bf16.mxu1 %v1402_v3  ;;  %p1325_p1 = pneg %p1324_p0 }
  0x28   : > { %1098 = vmatpush3.bf16.xpose.msra.mxu0 %v328_v13 }
  0x29   : > { %1167 = vmatprep.subr.msk.bf16.mxu0 %vm317_vm0, %v1242_v14  ;;  %1130 = vmatpush3.bf16.xpose.msra.mxu1 %v710_v19 }
  0x2a   : > { %1131 = vmatprep.subr.bf16.mxu1 %v1402_v3 }
  0x30   : > { %1100 = vmatpush3.bf16.xpose.msra.mxu0 %v331_v17 }
  0x31   : > { %1168 = vmatprep.subr.msk.bf16.mxu0 %vm317_vm0, %v1243_v18  ;;  %1132 = vmatpush3.bf16.xpose.msra.mxu1 %v713_v23  ;;  %v1404_v23 = vmov -1e+30  }
  0x32   : > { %1133 = vmatprep.subr.bf16.mxu1 %v1402_v3  ;;  %v655_v24 = vsel %vm457_vm2, 0.0, %v1404_v23 }
  0x38   : > { %1102 = vmatpush3.bf16.xpose.msra.mxu0 %v334_v21 }
  0x39   : > { %1169 = vmatprep.subr.msk.bf16.mxu0 %vm317_vm0, %v1244_v22  ;;  %1134 = vmatpush3.bf16.xpose.msra.mxu1 %v716_v27 }
  0x3a   : > { %1135 = vmatprep.subr.bf16.mxu1 %v1402_v3 }
  0x40   : > { %1104 = vmatpush3.bf16.xpose.msra.mxu0 %v337_v25 }
  0x41   : > { %1170 = vmatprep.subr.msk.bf16.mxu0 %vm317_vm0, %v1245_v26  ;;  %1136 = vmatpush3.bf16.xpose.msra.mxu1 %v719_v30 }
  0x42   : > { %1137 = vmatprep.subr.bf16.mxu1 %v1402_v3 }
  0x48   : > { %1106 = vmatpush3.bf16.xpose.msra.mxu0 %v340_v29  ;;  %v1405_v29 = vmov 0  }
  0x49   : > { %1143 = vmatprep.subr.bf16.mxu0 %v1402_v3  ;;  %1138 = vmatpush3.bf16.xpose.msra.mxu1 %v722_v32 }
  0x4a   : > { %1237 = vset.pattern.permute.xlu0 %v1405_v29 }
  0x4f   : > { %1108 = vmatmul.mubr.msk.bf16.vlgmr.msra.gmra.mrb[0].mxu0 %vm317_vm0, %v1494_v1 }
  0x50   : > { %1111 = vmatprep.mubr.msk.bf16.mxu0 %vm317_vm0, %v1505_v4  ;;  %1140 = vmatmul.mubr.msk.bf16.vlgmr.msra.gmra.mrb[0].mxu1 %vm317_vm0, %v635_v34 }
  0x57   : > { %1112 = vmatmul.mubr.msk.bf16.gmra.mrb[4].mxu0 %vm317_vm0, %v1241_v10 }
  0x58   : > { %1115 = vmatprep.mubr.msk.bf16.mxu0 %vm317_vm0, %v1242_v14 }
  0x5f   : > { %1116 = vmatmul.mubr.msk.bf16.gmra.mrb[8].mxu0 %vm317_vm0, %v1243_v18 }
  0x60   : > { %1119 = vmatprep.mubr.msk.bf16.mxu0 %vm317_vm0, %v1244_v22 }
  0x67   : > { %1120 = vmatmul.mubr.msk.bf16.gmra.mrb[12].mxu0 %vm317_vm0, %v1245_v26 }
  0x68   : > { %1159 = vmatprep.mubr.msk.bf16.mxu0 %vm1403_vm1, %v1402_v3 }
 0x122   : > { %v1109_v37 = vpop.f32.mrb[0].mxu0 }
 0x123   : > { %v441_v38 = vmul.f32 14.285714, %v1109_v37  ;;  %v376_v39 = vpop.f32.mrb[1].mxu0  ;;  %v758_v22 = vpop.f32.mrb[0].mxu1 }
 0x124   : > { %v439_v40 = vmul.f32 14.285714, %v376_v39  ;;  %v1110_v41 = vpop.f32.mrb[2].mxu0  ;;  %v1141_v25 = vpop.f32.mrb[1].mxu1  ;;  %v1683_v26 = vadd.f32 %v758_v22, %v655_v24 }
 0x125   : > { %v442_v42 = vmul.f32 14.285714, %v1110_v41  ;;  %v379_v43 = vpop.f32.mrb[3].mxu0  ;;  %v1603_v44 = vsel %vm457_vm2, %v441_v38, -1e+30  ;;  %v761_v27 = vpop.f32.mrb[2].mxu1 }
 0x126   : > { %v440_v45 = vmul.f32 14.285714, %v379_v43  ;;  %478 = vmax.xlane.f32.xlu1 %v1603_v44  ;;  %v1608_v46 = vsel %vm457_vm2, %v439_v40, -1e+30  ;;  %v1142_v28 = vpop.f32.mrb[3].mxu1 }
 0x127   : > { %474 = vmax.xlane.f32.xlu0 %v1608_v46  ;;  %v1613_v47 = vsel %vm457_vm2, %v442_v42, -1e+30 }
 0x128   : > { %v1618_v49 = vsel %vm457_vm2, %v440_v45, -1e+30 }
 0x12a   : > { %480 = vmax.xlane.f32.xlu1 %v1613_v47  ;;  %v1113_v48 = vpop.f32.mrb[4].mxu0 }
 0x12b   : > { %476 = vmax.xlane.f32.xlu0 %v1618_v49  ;;  %v392_v50 = vpop.f32.mrb[5].mxu0  ;;  %v445_v54 = vmul.f32 14.285714, %v1113_v48 }
 0x12c   : > { %v443_v51 = vmul.f32 14.285714, %v392_v50  ;;  %v1114_v52 = vpop.f32.mrb[6].mxu0 }
 0x12d   : > { %v395_v53 = vpop.f32.mrb[7].mxu0  ;;  %v446_v57 = vmul.f32 14.285714, %v1114_v52  ;;  %v1633_v60 = vsel %vm457_vm2, %v445_v54, -1e+30 }
 0x12e   : > { %v444_v55 = vmul.f32 14.285714, %v395_v53  ;;  %v1623_v56 = vsel %vm457_vm2, %v443_v51, -1e+30 }
 0x12f   : > { %482 = vmax.xlane.f32.xlu0 %v1623_v56  ;;  %v1638_v0 = vsel %vm457_vm2, %v446_v57, -1e+30 }
 0x130   : > { %v1628_v58 = vsel %vm457_vm2, %v444_v55, -1e+30 }
 0x131   : > { %484 = vmax.xlane.f32.xlu1 %v1628_v58 }
 0x132   : > { %v1117_v59 = vpop.f32.mrb[8].mxu0 }
 0x133   : > { %486 = vmax.xlane.f32.xlu0 %v1633_v60  ;;  %v408_v61 = vpop.f32.mrb[9].mxu0  ;;  %v449_v2 = vmul.f32 14.285714, %v1117_v59 }
 0x134   : > { %v447_v62 = vmul.f32 14.285714, %v408_v61  ;;  %v1118_v63 = vpop.f32.mrb[10].mxu0 }
 0x135   : > { %488 = vmax.xlane.f32.xlu1 %v1638_v0  ;;  %v411_v1 = vpop.f32.mrb[11].mxu0  ;;  %v450_v6 = vmul.f32 14.285714, %v1118_v63  ;;  %v1653_v9 = vsel %vm457_vm2, %v449_v2, -1e+30 }
 0x136   : > { %v448_v4 = vmul.f32 14.285714, %v411_v1  ;;  %v1643_v5 = vsel %vm457_vm2, %v447_v62, -1e+30 }
 0x137   : > { %490 = vmax.xlane.f32.xlu0 %v1643_v5  ;;  %v1658_v13 = vsel %vm457_vm2, %v450_v6, -1e+30 }
 0x138   : > { %v1648_v7 = vsel %vm457_vm2, %v448_v4, -1e+30 }
 0x139   : > { %492 = vmax.xlane.f32.xlu1 %v1648_v7 }
 0x13a   : > { %v1121_v8 = vpop.f32.mrb[12].mxu0 }
 0x13b   : > { %494 = vmax.xlane.f32.xlu0 %v1653_v9  ;;  %v424_v10 = vpop.f32.mrb[13].mxu0  ;;  %v453_v15 = vmul.f32 14.285714, %v1121_v8 }
 0x13c   : > { %v451_v11 = vmul.f32 14.285714, %v424_v10  ;;  %v1122_v12 = vpop.f32.mrb[14].mxu0 }
 0x13d   : > { %496 = vmax.xlane.f32.xlu1 %v1658_v13  ;;  %v427_v14 = vpop.f32.mrb[15].mxu0  ;;  %v454_v18 = vmul.f32 14.285714, %v1122_v12  ;;  %v1673_v20 = vsel %vm457_vm2, %v453_v15, -1e+30 }
 0x13e   : > { %v452_v16 = vmul.f32 14.285714, %v427_v14  ;;  %v1663_v17 = vsel %vm457_vm2, %v451_v11, -1e+30 }
 0x13f   : > { %498 = vmax.xlane.f32.xlu0 %v1663_v17  ;;  %v1678_v21 = vsel %vm457_vm2, %v454_v18, -1e+30 }
 0x140   : > { %v1668_v19 = vsel %vm457_vm2, %v452_v16, -1e+30 }
 0x141   : > { %500 = vmax.xlane.f32.xlu1 %v1668_v19 }
 0x143   : > { %502 = vmax.xlane.f32.xlu0 %v1673_v20 }
 0x145   : > { %504 = vmax.xlane.f32.xlu1 %v1678_v21 }
 0x1b3   : > { %v479_v30 = vpop.xlane.xlu1 %478 }
 0x1b4   : > { %v508_v31 = vsub.f32 %v1603_v44, %v479_v30  ;;  %v475_v32 = vpop.xlane.xlu0 %474 }
 0x1b5   : > { %v506_v33 = vsub.f32 %v1608_v46, %v475_v32 }
 0x1b6   : > { %v526_v34 = vmul.f32 1.442695, %v508_v31 }
 0x1b7   : > { %v481_v37 = vpop.xlane.xlu1 %480  ;;  %v522_v38 = vmul.f32 1.442695, %v506_v33 }
 0x1b8   : > { %1254 = vpow2.f32 %v526_v34  ;;  %v477_v39 = vpop.xlane.xlu0 %476  ;;  %v509_v40 = vsub.f32 %v1613_v47, %v481_v37  ;;  %v1755_v34 = vld [vmem:[%s248_s12] sm:$0xff]  ;;  %s1328_s12 = scalar_lea.vmem %s1327_s11, 256 }
 0x1b9   : > { %v507_v41 = vsub.f32 %v1618_v49, %v477_v39  ;;  %1256 = vpow2.f32 %v522_v38  ;;  %v776_v37 = vadd.s32 16, %v1755_v34  ;;  %vm775_vm3 = vcmp.lt.s32.totalorder %v1755_v34, 0  ;;  %p1330_p3 = scmp.lt.s32.totalorder %s1328_s12, %s1322_s9 }
 0x1ba   : > { %v528_v45 = vmul.f32 1.442695, %v509_v40  ;;  %vm782_vm8 = vcmp.ge.s32.totalorder %v1755_v34, 0 }
 0x1bb   : > { %v524_v42 = vmul.f32 1.442695, %v507_v41  ;;  %v777_v38 = vsel %vm775_vm3, %v776_v37, %v1755_v34  ;;  %p1331_p5 = por %p1330_p3, %p1329_p2 }
 0x1bc   : > { %v483_v43 = vpop.xlane.xlu0 %482 }
 0x1bd   : > { %1258 = vpow2.f32 %v524_v42  ;;  %v510_v50 = vsub.f32 %v1623_v56, %v483_v43  ;;  %p1332_p6 = pnand %p1331_p5, %p1325_p1 }
 0x1be   : > { %v485_v48 = vpop.xlane.xlu1 %484  ;;  %1260 = vpow2.f32 %v528_v45 }
 0x1bf   : > { %v511_v44 = vsub.f32 %v1628_v58, %v485_v48  ;;  %v530_v55 = vmul.f32 1.442695, %v510_v50 }
 0x1c0   : > { %v487_v46 = vpop.xlane.xlu0 %486 }
 0x1c1   : > { %v532_v51 = vmul.f32 1.442695, %v511_v44  ;;  %v512_v52 = vsub.f32 %v1633_v60, %v487_v46 }
 0x1c2   : > { %v1692_v53 = vpop.eup %1254  ;;  %v489_v47 = vpop.xlane.xlu1 %488 }
 0x1c3   : > { %v534_v54 = vmul.f32 1.442695, %v512_v52  ;;  %v513_v49 = vsub.f32 %v1638_v0, %v489_v47  ;;  %558 = vadd.xlane.f32.xlu0 %v1692_v53  ;;  %1262 = vpow2.f32 %v532_v51  ;;  %v1696_v59 = vpop.eup %1256 }
 0x1c4   : > { %v491_v57 = vpop.xlane.xlu0 %490 }
 0x1c5   : > { %1264 = vpow2.f32 %v534_v54  ;;  %v536_v58 = vmul.f32 1.442695, %v513_v49  ;;  %v514_v62 = vsub.f32 %v1643_v5, %v491_v57 }
 0x1c6   : > { %v493_v56 = vpop.xlane.xlu1 %492  ;;  %1266 = vpow2.f32 %v530_v55 }
 0x1c7   : > { %v1698_v61 = vpop.eup %1258  ;;  %v515_v60 = vsub.f32 %v1648_v7, %v493_v56  ;;  %554 = vadd.xlane.f32.xlu0 %v1696_v59  ;;  %1268 = vpow2.f32 %v536_v58  ;;  %v538_v10 = vmul.f32 1.442695, %v514_v62 }
 0x1c8   : > { %v495_v63 = vpop.xlane.xlu0 %494  ;;  %556 = vadd.xlane.f32.xlu1 %v1698_v61  ;;  %v1705_v4 = vpop.eup %1260 }
 0x1c9   : > { %v540_v0 = vmul.f32 1.442695, %v515_v60  ;;  %v516_v1 = vsub.f32 %v1653_v9, %v495_v63 }
 0x1ca   : > { %v497_v2 = vpop.xlane.xlu1 %496 }
 0x1cb   : > { %v542_v6 = vmul.f32 1.442695, %v516_v1  ;;  %v517_v8 = vsub.f32 %v1658_v13, %v497_v2  ;;  %1270 = vpow2.f32 %v540_v0 }
 0x1cc   : > { %v499_v7 = vpop.xlane.xlu0 %498  ;;  %560 = vadd.xlane.f32.xlu1 %v1705_v4 }
 0x1cd   : > { %1272 = vpow2.f32 %v542_v6  ;;  %v544_v5 = vmul.f32 1.442695, %v517_v8  ;;  %v1709_v11 = vpop.eup %1262  ;;  %v518_v15 = vsub.f32 %v1663_v17, %v499_v7 }
 0x1ce   : > { %v501_v12 = vpop.xlane.xlu1 %500  ;;  %1274 = vpow2.f32 %v538_v10 }
 0x1cf   : > { %v1711_v14 = vpop.eup %1264  ;;  %v519_v9 = vsub.f32 %v1668_v19, %v501_v12  ;;  %1276 = vpow2.f32 %v544_v5  ;;  %v546_v27 = vmul.f32 1.442695, %v518_v15 }
 0x1d0   : > { %566 = vadd.xlane.f32.xlu0 %v1711_v14  ;;  %v503_v13 = vpop.xlane.xlu0 %502  ;;  %564 = vadd.xlane.f32.xlu1 %v1709_v11  ;;  %v1718_v22 = vpop.eup %1266 }
 0x1d1   : > { %v548_v16 = vmul.f32 1.442695, %v519_v9  ;;  %v520_v18 = vsub.f32 %v1673_v20, %v503_v13  ;;  %v1720_v24 = vpop.eup %1268 }
 0x1d2   : > { %v505_v23 = vpop.xlane.xlu1 %504 }
 0x1d3   : > { %v550_v25 = vmul.f32 1.442695, %v520_v18  ;;  %v521_v19 = vsub.f32 %v1678_v21, %v505_v23  ;;  %1278 = vpow2.f32 %v548_v16 }
 0x1d4   : > { %562 = vadd.xlane.f32.xlu0 %v1718_v22  ;;  %568 = vadd.xlane.f32.xlu1 %v1720_v24 }
 0x1d5   : > { %1280 = vpow2.f32 %v550_v25  ;;  %v552_v17 = vmul.f32 1.442695, %v521_v19  ;;  %v1725_v28 = vpop.eup %1270 }
 0x1d6   : > { %1282 = vpow2.f32 %v546_v27 }
 0x1d7   : > { %v1727_v20 = vpop.eup %1272  ;;  %1284 = vpow2.f32 %v552_v17 }
 0x1d8   : > { %574 = vadd.xlane.f32.xlu0 %v1727_v20  ;;  %572 = vadd.xlane.f32.xlu1 %v1725_v28  ;;  %v1731_v21 = vpop.eup %1274 }
 0x1d9   : > { %v1733_v29 = vpop.eup %1276 }
 0x1dc   : > { %570 = vadd.xlane.f32.xlu0 %v1731_v21  ;;  %576 = vadd.xlane.f32.xlu1 %v1733_v29 }
 0x1dd   : > { %v1737_v30 = vpop.eup %1278 }
 0x1df   : > { %v1739_v31 = vpop.eup %1280 }
 0x1e0   : > { %582 = vadd.xlane.f32.xlu0 %v1739_v31  ;;  %580 = vadd.xlane.f32.xlu1 %v1737_v30  ;;  %v1743_v32 = vpop.eup %1282 }
 0x1e1   : > { %v1746_v33 = vpop.eup %1284 }
 0x1e4   : > { %578 = vadd.xlane.f32.xlu0 %v1743_v32  ;;  %584 = vadd.xlane.f32.xlu1 %v1746_v33 }
 0x1e8   : > { %764 = vmax.xlane.f32.xlu1 %v1683_v26 }
 0x1fa   : > { %779 = vperm.xlu0 %1237, %v777_v38  }
 0x250   : > { %v559_v39 = vpop.xlane.xlu0 %558 }
 0x254   : > { %v555_v40 = vpop.xlane.xlu0 %554 }
 0x255   : > { %1286 = vrcp.f32 %v555_v40  ;;  %v557_v41 = vpop.xlane.xlu1 %556 }
 0x256   : > { %1288 = vrcp.f32 %v557_v41 }
 0x257   : > { %1290 = vrcp.f32 %v559_v39 }
 0x259   : > { %v561_v42 = vpop.xlane.xlu1 %560 }
 0x25a   : > { %1292 = vrcp.f32 %v561_v42 }
 0x25d   : > { %v567_v43 = vpop.xlane.xlu0 %566  ;;  %v565_v45 = vpop.xlane.xlu1 %564 }
 0x25e   : > { %1294 = vrcp.f32 %v565_v45 }
 0x25f   : > { %v1287_v48 = vpop.eup %1286 }
 0x260   : > { %v1289_v44 = vpop.eup %1288  ;;  %v587_v50 = vmul.f32 %v1287_v48, %v1696_v59  ;;  %v790_v48 = vstv %s1043_s13 }
 0x261   : > { %v563_v46 = vpop.xlane.xlu0 %562  ;;  %v569_v51 = vpop.xlane.xlu1 %568  ;;  %v589_v52 = vmul.f32 %v1289_v44, %v1698_v61 }
 0x262   : > { %v1291_v47 = vpop.eup %1290  ;;  %1296 = vrcp.f32 %v563_v46 }
 0x263   : > { %1298 = vrcp.f32 %v569_v51  ;;  %v618_v54 = vpack.c.bf16 %v589_v52, %v587_v50  ;;  %v591_v58 = vmul.f32 %v1291_v47, %v1692_v53 }
 0x264   : > { %v1293_v49 = vpop.eup %1292  ;;  %1300 = vrcp.f32 %v567_v43 }
 0x265   : > { %v575_v55 = vpop.xlane.xlu0 %574  ;;  %1144 = vmatpush3.bf16.msra.mxu0 %v618_v54  ;;  %v573_v57 = vpop.xlane.xlu1 %572  ;;  %v593_v56 = vmul.f32 %v1293_v49, %v1705_v4 }
 0x266   : > { %1145 = vmatprep.subr.bf16.mxu0 %v1402_v3  ;;  %1302 = vrcp.f32 %v573_v57 }
 0x267   : > { %v619_v59 = vpack.c.bf16 %v593_v56, %v591_v58 }
 0x268   : > { %v1295_v62 = vpop.eup %1294 }
 0x269   : > { %v571_v60 = vpop.xlane.xlu0 %570  ;;  %1146 = vmatpush3.bf16.msra.mxu0 %v619_v59  ;;  %v577_v61 = vpop.xlane.xlu1 %576  ;;  %v597_v4 = vmul.f32 %v1295_v62, %v1709_v11 }
 0x26a   : > { %1304 = vrcp.f32 %v571_v60  ;;  %1147 = vmatprep.subr.bf16.mxu0 %v1402_v3 }
 0x26b   : > { %1306 = vrcp.f32 %v577_v61 }
 0x26c   : > { %v1297_v63 = vpop.eup %1296  ;;  %1308 = vrcp.f32 %v575_v55 }
 0x26d   : > { %v1299_v0 = vpop.eup %1298  ;;  %v583_v1 = vpop.xlane.xlu0 %582  ;;  %v595_v53 = vmul.f32 %v1297_v63, %v1718_v22 }
 0x26e   : > { %v581_v2 = vpop.xlane.xlu1 %580  ;;  %v1301_v6 = vpop.eup %1300  ;;  %v601_v10 = vmul.f32 %v1299_v0, %v1720_v24 }
 0x26f   : > { %v620_v8 = vpack.c.bf16 %v597_v4, %v595_v53  ;;  %1310 = vrcp.f32 %v581_v2  ;;  %v599_v12 = vmul.f32 %v1301_v6, %v1711_v14 }
 0x270   : > { %v1303_v9 = vpop.eup %1302 }
 0x271   : > { %v579_v7 = vpop.xlane.xlu0 %578  ;;  %1148 = vmatpush3.bf16.msra.mxu0 %v620_v8  ;;  %v621_v15 = vpack.c.bf16 %v601_v10, %v599_v12  ;;  %v605_v22 = vmul.f32 %v1303_v9, %v1725_v28 }
 0x272   : > { %v585_v5 = vpop.xlane.xlu1 %584  ;;  %1312 = vrcp.f32 %v579_v7  ;;  %1149 = vmatprep.subr.bf16.mxu0 %v1402_v3 }
 0x273   : > { %1314 = vrcp.f32 %v585_v5 }
 0x274   : > { %v1305_v13 = vpop.eup %1304  ;;  %1316 = vrcp.f32 %v583_v1 }
 0x275   : > { %v1307_v16 = vpop.eup %1306  ;;  %1150 = vmatpush3.bf16.msra.mxu0 %v621_v15  ;;  %v603_v18 = vmul.f32 %v1305_v13, %v1731_v21 }
 0x276   : > { %v1771_v11 = vpop.xlane.xlu1 %764  ;;  %v1309_v23 = vpop.eup %1308  ;;  %1151 = vmatprep.subr.bf16.mxu0 %v1402_v3  ;;  %v609_v25 = vmul.f32 %v1307_v16, %v1733_v29 }
 0x277   : > { %v766_v14 = vsub.f32 %v1683_v26, %v1771_v11  ;;  %v622_v24 = vpack.c.bf16 %v605_v22, %v603_v18  ;;  %v607_v27 = vmul.f32 %v1309_v23, %v1727_v20 }
 0x279   : > { %v767_v19 = vmul.f32 1.442695, %v766_v14  ;;  %1152 = vmatpush3.bf16.msra.mxu0 %v622_v24  ;;  %v1311_v17 = vpop.eup %1310  ;;  %v623_v21 = vpack.c.bf16 %v609_v25, %v607_v27  ;;  %v780_v20 = vpop.permute.xlu0 %779 }
 0x27a   : > { %1153 = vmatprep.subr.bf16.mxu0 %v1402_v3  ;;  %v613_v39 = vmul.f32 %v1311_v17, %v1737_v30  ;;  %vm781_vm4 = vcmp.eq.s32.totalorder %v1598_v36, %v780_v20 }
 0x27b   : > { %1318 = vpow2.f32 %v767_v19  ;;  %vm1045_vm5 = vmpackc.low %vm781_vm4, %vm781_vm4  ;;  %v783_v30 = vsel %vm781_vm4, %v1683_v26, 0.0 }
 0x27c   : > { %v1313_v37 = vpop.eup %1312 }
 0x27d   : > { %v1315_v28 = vpop.eup %1314  ;;  %1154 = vmatpush3.bf16.msra.mxu0 %v623_v21  ;;  %v611_v38 = vmul.f32 %v1313_v37, %v1743_v32  ;;  %v1406_v32 = vmov 1.0|1.0  }
 0x27e   : > { %v1317_v40 = vpop.eup %1316  ;;  %1155 = vmatprep.subr.bf16.mxu0 %v1402_v3  ;;  %v617_v41 = vmul.f32 %v1315_v28, %v1746_v33  ;;  %v789_v33 = vshrl.u32 %v455_v35, 7 }
 0x27f   : > { %v624_v29 = vpack.c.bf16 %v613_v39, %v611_v38  ;;  %v615_v42 = vmul.f32 %v1317_v40, %v1739_v31 }
 0x280   : > { %v791_v44 = vadd.s32 %v790_v48, %v789_v33 }
 0x281   : > { %1156 = vmatpush3.bf16.msra.mxu0 %v624_v29  ;;  %v625_v43 = vpack.c.bf16 %v617_v41, %v615_v42 }
 0x282   : > { %1157 = vmatprep.subr.bf16.mxu0 %v1402_v3  ;;  %vm792_vm6 = vcmp.lt.s32.totalorder %v791_v44, 8 }
 0x283   : > { %v1047_v51 = vsel %vm792_vm6, 1.0, %v1402_v3 }
 0x284   : > { %v852_v54 = vsel %vm851_vm7, %v1047_v51, 0.0 }
 0x285   : > { %v1319_v45 = vpop.eup %1318  ;;  %1158 = vmatpush3.bf16.msra.mxu0 %v625_v43 }
 0x286   : > { %769 = vadd.xlane.f32.xlu1 %v1319_v45 }
 0x288   : > { %1160 = vmatmul.mubr.msk.bf16.vlgmr.msra.gmra.mrb[16].mxu0 %vm1045_vm5, %v1406_v32 }
 0x28a   : > { %784 = vadd.xlane.f32.xlu1 %v783_v30 }
 0x313   : > { %v770_v49 = vpop.xlane.xlu1 %769 }
 0x314   : > { %1320 = vlog2.f32 %v770_v49 }
 0x317   : > { %v785_v57 = vpop.xlane.xlu1 %784 }
 0x318   : > { %vm872_vm9 = vcmp.eq.f32.partialorder %v785_v57, %v1771_v11 }
 0x319   : > { %vm873_vm10 = vmand %vm872_vm9, %vm782_vm8 }
 0x31a   : > { %v1048_v62 = vsel %vm873_vm10, 1.0, %v1402_v3 }
 0x31b   : > { %v876_v0 = vsel %vm851_vm7, %v1048_v62, 0.0 }
 0x31e   : > { %v1321_v35 = vpop.eup %1320 }
 0x31f   : > { %v772_v55 = vmul.f32 0.6931472, %v1321_v35 }
 0x35b   : > { %v838_v31 = vpop.f32.mrb[16].mxu0 }
 0x35c   : > { %v844_v50 = vmul.f32 %v838_v31, %v1683_v26  ;;  %v1161_v46 = vpop.f32.mrb[17].mxu0  ;;  %v773_v26 = vadd.f32 %v772_v55, %v1771_v11 }
 0x35d   : > { %v841_v52 = vpop.f32.mrb[18].mxu0 }
 0x35e   : > { %v1162_v47 = vpop.f32.mrb[19].mxu0  ;;  %845 = vadd.xlane.f32.xlu1 %v844_v50 }
 0x362   : > { %853 = vadd.xlane.f32.xlu1 %v852_v54 }
 0x3eb   : > { %v846_v58 = vpop.xlane.xlu1 %845 }
 0x3ec   : > { %v847_v56 = vsub.f32 %v773_v26, %v846_v58 }
 0x3ee   : > { %v848_v59 = vsel %vm792_vm6, %v847_v56, 0.0 }
 0x3ef   : > { %v862_v60 = vsel %vm851_vm7, %v848_v59, 0.0  ;;  %v854_v61 = vpop.xlane.xlu1 %853 }
 0x3f0   : > { %863 = vadd.xlane.f32.xlu1 %v862_v60  ;;  %v855_v63 = vrot.slane %v854_v61, 4 }
 0x3f2   : > { %v856_v1 = vadd.f32 %v855_v63, %v854_v61 }
 0x3f4   : > { %877 = vadd.xlane.f32.xlu1 %v876_v0  ;;  %v857_v34 = vrot.slane %v856_v1, 2 }
 0x3f6   : > { %v858_v2 = vadd.f32 %v857_v34, %v856_v1 }
 0x3f8   : > { %v859_v53 = vrot.slane %v858_v2, 1 }
 0x3fa   : > { %v860_v4 = vadd.f32 %v859_v53, %v858_v2 }
 0x3fc   : > { %1171 = vpush %v860_v4 }
 0x42d   : > { %s1172_s22 = spop %1171 }
 0x42e   : > { %v909_v14 = vstv %s1172_s22 }
 0x47d   : > { %v864_v6 = vpop.xlane.xlu1 %863 }
 0x47e   : > { %v865_v8 = vrot.slane %v864_v6, 4 }
 0x480   : > { %v866_v10 = vadd.f32 %v865_v8, %v864_v6 }
 0x481   : > { %v878_v7 = vpop.xlane.xlu1 %877 }
 0x482   : > { %v867_v5 = vrot.slane %v866_v10, 2  ;;  %v879_v12 = vrot.slane %v878_v7, 4 }
 0x484   : > { %v880_v9 = vadd.f32 %v879_v12, %v878_v7  ;;  %v868_v3 = vadd.f32 %v867_v5, %v866_v10 }
 0x486   : > { %v881_v15 = vrot.slane %v880_v9, 2  ;;  %v869_v13 = vrot.slane %v868_v3, 1 }
 0x488   : > { %v882_v16 = vadd.f32 %v881_v15, %v880_v9  ;;  %v870_v11 = vadd.f32 %v869_v13, %v868_v3 }
 0x48a   : > { %1173 = vpush %v870_v11  ;;  %v883_v18 = vrot.slane %v882_v16, 1 }
 0x48c   : > { %v884_v22 = vadd.f32 %v883_v18, %v882_v16 }
 0x48e   : > { %1175 = vpush %v884_v22 }
 0x4bb   : > { %s1174_s24 = spop %1173 }
 0x4bc   : > { %v911_v25 = vstv %s1174_s24 }
 0x4bf   : > { %s1176_s29 = spop %1175 }
 0x4c0   : > { %v907_v23 = vstv %s1176_s29 }
 0x4c1   : > { %v908_v24 = vsel %vm905_vm11, %v907_v23, 0.0 }
 0x4c2   : > { %v910_v19 = vsel %vm903_vm12, %v909_v14, %v908_v24 }
 0x4c3   : > { %v912_v27 = vsel %vm901_vm13, %v911_v25, %v910_v19 }
 0x4c4   : > { %913 = vst [vmem:[%s233_s30] sm:$0xff] %v912_v27 }
 0x4c5   : > { %1335 = shalt.err (!%p1332_p6)
}
 0x4c6   : > { %s1336_s13 = scalar_lea.hbm %s1810_s8, 128  ;;  %s1340_s22 = scalar_lea.hbm %s1861_s4, 256 }
 0x4c7   : > { %p1337_p7 = scmp.ne.s32.totalorder %s1810_s8, %s1336_s13  ;;  %p1341_p11 = scmp.lt.u32.totalorder %s1810_s8, %s1861_s4 }
 0x4c8   : > { %p1342_p12 = scmp.lt.u32.totalorder %s1340_s22, %s1336_s13  ;;  %p1344_p0 = scmp.lt.u32.totalorder %s1336_s13, %s1810_s8 }
 0x4c9   : > { %p1338_p9 = pnand %p1337_p7, %p1473_p4 }
 0x4ca   : > { %p1343_p13 = por %p1342_p12, %p1341_p11 }
 0x4cb   : > { %p1339_p10 = pneg %p1338_p9 }
 0x4cc   : > { %p1345_p1 = por %p1344_p0, %p1343_p13 }
 0x4ce   : > { %p1346_p2 = pnand %p1345_p1, %p1339_p10 }
 0x4d0   : > { %1349 = shalt.err (!%p1346_p2)
}
 0x4d1   : > { %1177 = dma.vmem_to_hbm [thread:$0]  (%p1473_p4), %s1812_s5, 128, %s1810_s8, %s915_s18  }
 0x4d2 PF: > { %p1183_p3 = scmp.ge.s32.totalorder %s1400_s20, 2  ;;  %s940_s29 = sand.u32 1, %s1380_s15  }
 0x4d3   : > { %s941_s30 = scalar_lea.sflag [#allocation5], %s940_s29 }
 0x4d4   : > { %p1180_p5 = pnand %p1183_p3, %p1480_p8 }
 0x4d6   : > { %1375 = dma.done.wait (!%p1180_p5), %s941_s30, 128  }
 0x4d7   : > { %1377 = vsyncadd (!%p1180_p5), %s941_s30, 4294967168  ;;  %s17_s20 = sadd.s32 1, %s1400_s20   ;;  %s1864_s15 = smov %s1384_s16 }
 0x4d8   : > { %p14_p6 = scmp.ge.s32.totalorder %s17_s20, 4   ;;  %s1865_s16 = smov %s1388_s17 }
 0x4d9   : > { %s1866_s17 = smov %s1486_s28  ;;  %s1867_s18 = smov %s1396_s19 }
 0x4da   : > { %s1868_s19 = smov %s1870_s23  ;;  %16 = sbr.rel (!%p14_p6) target bundleno = 4 (0x4), region = 88 }
 0x4e1   :  { %946 = vsyncpa [#allocation5], 1 }
 0x4e2   :  { %948 = vsyncpa [#allocation5 + $0x1], 1 }

</bundles_post_ra>
